<compile_context>
chip_gen: v7x
topology: tpu7x:2x2x1
jax: 0.10.0
libtpu: 0.0.40
codegen_flags: <defaults>
</compile_context>

<pallas_src>
import jax
import jax.numpy as jnp
from jax.experimental import pallas as pl
from jax.experimental.pallas import tpu as pltpu


# ------------------------------- Pallas kernel -------------------------------
def fused_conv_block_kernel(x_ref, w1_ref, w2_ref, sh1_ref, sh2_ref, o_ref,
                            xpad1, xpad2):
    """NB images per step: [conv3x3 + folded BN + ReLU] x 2; layer-1 act stays in VMEM.

    x_ref:   (NB, H, W*Cin)       f32 lane-dense input images
    w1_ref:  (3, W*Cin,  W*Cout)  bf16 banded layer-1 weights (BN scale folded in)
    w2_ref:  (3, W*Cout, W*Cout)  bf16 banded layer-2 weights (BN scale folded in)
    sh*_ref: (1, W*Cout)          f32 BN shift, lane j*Cout+o -> channel o
    o_ref:   (NB, H, W*Cout)      f32 lane-dense output
    xpad1:   (NB*(H+2), W*Cin)    f32 stacked row-padded inputs (per-image zero halos)
    xpad2:   (NB*(H+2), W*Cout)   f32 stacked row-padded layer-1 activations
    """
    NB, H, _ = x_ref.shape
    WCo = o_ref.shape[2]
    S = H + 2                      # padded rows per image
    M = NB * S - 2                 # banded-matmul M: covers every image's valid output rows

    # Zero the per-image row halos once; only interiors are written below, so the halos
    # stay zero across later grid steps (scratch persists across iterations).
    @pl.when(pl.program_id(0) == 0)
    def _():
        xpad1[...] = jnp.zeros_like(xpad1)
        xpad2[...] = jnp.zeros_like(xpad2)

    def conv3x3_banded(xpad_ref, w_ref):
        # 3x3 'same' conv over the whole stacked batch as 3 banded matmuls.
        # bf16 MXU operands, f32 accumulation.  Result rows that straddle two images'
        # halos are junk and are simply never read back.
        acc = jnp.zeros((M, WCo), jnp.float32)
        for kh in range(3):                                     # static, unrolled
            acc = acc + jnp.dot(
                xpad_ref[kh:kh + M, :].astype(jnp.bfloat16), w_ref[kh],
                preferred_element_type=jnp.float32)
        return acc

    # ---- layer 1: Conv + BN (scale folded into w; shift added here) + Dropout(eval=id) + ReLU
    for n in range(NB):                                         # static unroll, NB is small
        xpad1[n * S + 1:n * S + 1 + H, :] = x_ref[n]
    y1 = jnp.maximum(conv3x3_banded(xpad1, w1_ref) + sh1_ref[...], 0.0)

    # ---- layer 2: reads the layer-1 activation straight from VMEM (no HBM round trip)
    for n in range(NB):
        xpad2[n * S + 1:n * S + 1 + H, :] = y1[n * S:n * S + H, :]
    y2 = jnp.maximum(conv3x3_banded(xpad2, w2_ref) + sh2_ref[...], 0.0)

    for n in range(NB):                                         # unmasked lane-dense stores
        o_ref[n] = y2[n * S:n * S + H, :].astype(o_ref.dtype)


# --------------------------- wrapper-side glue ------------------------------
def band_conv_weights(w_hwio, W):
    """(3, 3, Cin, Cout) HWIO -> (3, W*Cin, W*Cout) banded weights.

    wb[kh, jc*Cin + c, j*Cout + o] = w[kh, kw, c, o] with jc = j + kw - 1.
    Out-of-range taps (column padding) are dropped, so the kernel's padded scratch only
    needs a zero ROW halo and the interior stores stay lane-aligned.
    (In a real model this is one-time precompute, not per-forward work.)
    """
    KH, KW, Cin, Cout = w_hwio.shape
    wb = jnp.zeros((KH, W * Cin, W * Cout), w_hwio.dtype)
    for kw in range(KW):
        for j in range(W):
            jc = j + kw - 1
            if 0 <= jc < W:
                wb = wb.at[:, jc * Cin:(jc + 1) * Cin,
                           j * Cout:(j + 1) * Cout].set(w_hwio[:, kw])
    return wb


def fold_bn(gamma, beta, mean, var, conv_bias=None, eps=1e-5):
    inv_std = 1.0 / jnp.sqrt(var + eps)
    scale = gamma * inv_std
    bias = conv_bias if conv_bias is not None else 0.0
    shift = (bias - mean) * scale + beta
    return scale, shift


@jax.jit
def conv_block_forward(x_nchw, p):
    """Full conv_block forward. Input NCHW (PyTorch convention), output NCHW."""
    N, Cin, H, W = x_nchw.shape
    Cout = p["w1"].shape[-1]
    S = H + 2

    # Images per grid step: the largest divisor of N keeping the banded-matmul M within
    # the MXU row count (256 on v6e/v7x).  For the demo (N=2, H=16) -> NB=2, grid=(1,).
    NB = 1
    for cand in range(1, N + 1):
        if N % cand == 0 and cand * S <= 256:
            NB = cand

    # NCHW -> NHWC -> lane-dense (N, H, W*Cin).  (Interface glue only; keep the model NHWC
    # end-to-end to drop this extra HBM pass.)
    x = jnp.transpose(x_nchw, (0, 2, 3, 1)).reshape(N, H, W * Cin)

    s1, sh1 = fold_bn(p["g1"], p["be1"], p["m1"], p["v1"], conv_bias=p["b1"])
    s2, sh2 = fold_bn(p["g2"], p["be2"], p["m2"], p["v2"], conv_bias=None)
    # Fold BN scale into the conv weights' output channels, then band + cast to bf16.
    w1b = band_conv_weights(p["w1"] * s1, W).astype(jnp.bfloat16)   # (3, W*Cin,  W*Cout)
    w2b = band_conv_weights(p["w2"] * s2, W).astype(jnp.bfloat16)   # (3, W*Cout, W*Cout)

    def tile_lanes(v):                        # (Cout,) -> (1, W*Cout); lane j*Cout+o -> v[o]
        return jnp.tile(v.astype(jnp.float32), W).reshape(1, W * Cout)

    out = pl.pallas_call(
        fused_conv_block_kernel,
        out_shape=jax.ShapeDtypeStruct((N, H, W * Cout), jnp.float32),
        grid=(N // NB,),
        in_specs=[
            pl.BlockSpec((NB, H, W * Cin), lambda g: (g, 0, 0)),
            pl.BlockSpec(w1b.shape, lambda g: (0, 0, 0)),
            pl.BlockSpec(w2b.shape, lambda g: (0, 0, 0)),
            pl.BlockSpec((1, W * Cout), lambda g: (0, 0)),
            pl.BlockSpec((1, W * Cout), lambda g: (0, 0)),
        ],
        out_specs=pl.BlockSpec((NB, H, W * Cout), lambda g: (g, 0, 0)),
        scratch_shapes=[
            pltpu.VMEM((NB * S, W * Cin), jnp.float32),    # stacked padded layer-1 input
            pltpu.VMEM((NB * S, W * Cout), jnp.float32),   # stacked padded layer-1 activation
        ],
        compiler_params=pltpu.CompilerParams(dimension_semantics=("parallel",)),
    )(x, w1b, w2b, tile_lanes(sh1), tile_lanes(sh2))

    # (N, H, W*Cout) -> NHWC is a free metadata reshape; NHWC -> NCHW is interface glue.
    return jnp.transpose(out.reshape(N, H, W, Cout), (0, 3, 1, 2))


# ------------------------- parameter setup (glue) ---------------------------
def make_params(key, in_c, out_c):
    ks = jax.random.split(key, 12)
    p = {}
    # layer1: Conv2d(in_c, out_c, 3x3, bias=True) + BN(out_c)
    p["w1"] = 0.1 * jax.random.normal(ks[0], (3, 3, in_c, out_c), jnp.float32)  # HWIO
    p["b1"] = 0.1 * jax.random.normal(ks[1], (out_c,), jnp.float32)
    p["g1"] = 1.0 + 0.1 * jax.random.normal(ks[2], (out_c,), jnp.float32)
    p["be1"] = 0.1 * jax.random.normal(ks[3], (out_c,), jnp.float32)
    p["m1"] = 0.05 * jax.random.normal(ks[4], (out_c,), jnp.float32)
    p["v1"] = 1.0 + 0.1 * jax.random.uniform(ks[5], (out_c,), jnp.float32)
    # layer2: Conv2d(out_c, out_c, 3x3, bias=False) + BN(out_c)
    p["w2"] = 0.1 * jax.random.normal(ks[6], (3, 3, out_c, out_c), jnp.float32)
    p["g2"] = 1.0 + 0.1 * jax.random.normal(ks[7], (out_c,), jnp.float32)
    p["be2"] = 0.1 * jax.random.normal(ks[8], (out_c,), jnp.float32)
    p["m2"] = 0.05 * jax.random.normal(ks[9], (out_c,), jnp.float32)
    p["v2"] = 1.0 + 0.1 * jax.random.uniform(ks[10], (out_c,), jnp.float32)
    return p


# ------------------------------ references -----------------------------------
def _conv_same(x_nhwc, w_hwio):
    return jax.lax.conv_general_dilated(
        x_nhwc, w_hwio, window_strides=(1, 1), padding="SAME",
        dimension_numbers=("NHWC", "HWIO", "NHWC"))


def _q(x):
    """Mirror the kernel's bf16 MXU-operand quantization (products accumulate in f32)."""
    return x.astype(jnp.bfloat16).astype(jnp.float32)


def ref_forward_quantized(x_nchw, p):
    """Reference with the SAME bf16 operand quantization as the kernel (tight check)."""
    x = _q(jnp.transpose(x_nchw, (0, 2, 3, 1)))
    s1, sh1 = fold_bn(p["g1"], p["be1"], p["m1"], p["v1"], conv_bias=p["b1"])
    s2, sh2 = fold_bn(p["g2"], p["be2"], p["m2"], p["v2"], conv_bias=None)
    w1q, w2q = _q(p["w1"] * s1), _q(p["w2"] * s2)
    y = jnp.maximum(_conv_same(x, w1q) + sh1, 0.0)
    y = jnp.maximum(_conv_same(_q(y), w2q) + sh2, 0.0)
    return jnp.transpose(y, (0, 3, 1, 2))


def ref_layer_f32(x_nhwc, w, bias, gamma, beta, mean, var, eps=1e-5):
    y = _conv_same(x_nhwc, w)
    if bias is not None:
        y = y + bias
    y = gamma * (y - mean) / jnp.sqrt(var + eps) + beta
    return jnp.maximum(y, 0.0)


def ref_forward_f32(x_nchw, p):
    """Plain f32 eval-mode conv_block (Dropout = identity) — semantic sanity check."""
    x = jnp.transpose(x_nchw, (0, 2, 3, 1))
    x = ref_layer_f32(x, p["w1"], p["b1"], p["g1"], p["be1"], p["m1"], p["v1"])
    x = ref_layer_f32(x, p["w2"], None, p["g2"], p["be2"], p["m2"], p["v2"])
    return jnp.transpose(x, (0, 3, 1, 2))


# --------------------------------- main --------------------------------------
if __name__ == "__main__":
    key = jax.random.PRNGKey(0)
    k_x, k_p = jax.random.split(key)

    N, in_c, out_c, H, W = 2, 4, 8, 16, 16
    x = jax.random.normal(k_x, (N, in_c, H, W), jnp.float32)  # NCHW, like PyTorch
    params = make_params(k_p, in_c, out_c)

    out = jax.block_until_ready(conv_block_forward(x, params))
    ref_q = jax.block_until_ready(ref_forward_quantized(x, params))
    ref_f = jax.block_until_ready(ref_forward_f32(x, params))

    assert out.shape == (N, out_c, H, W), out.shape
    # Tight check vs a reference with identical bf16-operand quantization.
    assert jnp.allclose(out, ref_q, atol=1e-3, rtol=1e-3), "mismatch vs bf16-quantized reference"
    # Loose semantic check vs the pure-f32 PyTorch-equivalent forward.
    assert jnp.allclose(out, ref_f, atol=2e-1, rtol=2e-1), "mismatch vs f32 reference"

    print("KERNEL_OK")
</pallas_src>

<mosaic_0001>
module attributes {stable_mosaic.version = 11 : i64} {
  func.func @fused_conv_block_kernel(%arg0: i32, %arg1: memref<2x16x64xf32, #tpu.memory_space<vmem>>, %arg2: memref<3x64x128xbf16, #tpu.memory_space<vmem>>, %arg3: memref<3x128x128xbf16, #tpu.memory_space<vmem>>, %arg4: memref<1x128xf32, #tpu.memory_space<vmem>>, %arg5: memref<1x128xf32, #tpu.memory_space<vmem>>, %arg6: memref<2x16x128xf32, #tpu.memory_space<vmem>>, %arg7: memref<36x64xf32, #tpu.memory_space<vmem>>, %arg8: memref<36x128xf32, #tpu.memory_space<vmem>>) attributes {dimension_semantics = [#tpu.dimension_semantics<parallel>], iteration_bounds = array<i64: 1>, scalar_prefetch = 0 : i64, scratch_operands = 2 : i64, tpu.core_type = #tpu.core_type<tc>, window_params = [{transform_indices = @transform_0, window_bounds = array<i64: 2, 16, 64>}, {pipeline_mode = #tpu.pipeline_mode<synchronous>, transform_indices = @transform_1, window_bounds = array<i64: 3, 64, 128>}, {pipeline_mode = #tpu.pipeline_mode<synchronous>, transform_indices = @transform_2, window_bounds = array<i64: 3, 128, 128>}, {pipeline_mode = #tpu.pipeline_mode<synchronous>, transform_indices = @transform_3, window_bounds = array<i64: 1, 128>}, {pipeline_mode = #tpu.pipeline_mode<synchronous>, transform_indices = @transform_4, window_bounds = array<i64: 1, 128>}, {transform_indices = @transform_5, window_bounds = array<i64: 2, 16, 128>}]} {
    %c0_i32 = arith.constant 0 : i32
    %0 = arith.cmpi eq, %arg0, %c0_i32 : i32
    %1 = arith.extui %0 : i1 to i32
    %c0_i32_0 = arith.constant 0 : i32
    %2 = arith.cmpi ne, %1, %c0_i32_0 : i32
    scf.if %2 {
      %cst_60 = arith.constant 0.000000e+00 : f32
      %69 = vector.broadcast %cst_60 : f32 to vector<36x64xf32>
      %c0_61 = arith.constant 0 : index
      %c0_62 = arith.constant 0 : index
      %70 = vector.load %arg7[%c0_61, %c0_62] : memref<36x64xf32, #tpu.memory_space<vmem>>, vector<36x64xf32>
      tpu.vector_store %arg7[%c0_61, %c0_62], %69 {strides = array<i32>} : memref<36x64xf32, #tpu.memory_space<vmem>>, vector<36x64xf32>,
      %cst_63 = arith.constant 0.000000e+00 : f32
      %71 = vector.broadcast %cst_63 : f32 to vector<36x128xf32>
      %c0_64 = arith.constant 0 : index
      %c0_65 = arith.constant 0 : index
      %72 = vector.load %arg8[%c0_64, %c0_65] : memref<36x128xf32, #tpu.memory_space<vmem>>, vector<36x128xf32>
      tpu.vector_store %arg8[%c0_64, %c0_65], %71 {strides = array<i32>} : memref<36x128xf32, #tpu.memory_space<vmem>>, vector<36x128xf32>,
    } else {
    }
    %c0 = arith.constant 0 : index
    %c0_1 = arith.constant 0 : index
    %c0_2 = arith.constant 0 : index
    %3 = vector.load %arg1[%c0, %c0_1, %c0_2] : memref<2x16x64xf32, #tpu.memory_space<vmem>>, vector<1x16x64xf32>
    %4 = vector.shape_cast %3 : vector<1x16x64xf32> to vector<16x64xf32>
    %c1 = arith.constant 1 : index
    %c0_3 = arith.constant 0 : index
    %5 = vector.load %arg7[%c1, %c0_3] : memref<36x64xf32, #tpu.memory_space<vmem>>, vector<16x64xf32>
    tpu.vector_store %arg7[%c1, %c0_3], %4 {strides = array<i32>} : memref<36x64xf32, #tpu.memory_space<vmem>>, vector<16x64xf32>,
    %c1_4 = arith.constant 1 : index
    %c0_5 = arith.constant 0 : index
    %c0_6 = arith.constant 0 : index
    %6 = vector.load %arg1[%c1_4, %c0_5, %c0_6] : memref<2x16x64xf32, #tpu.memory_space<vmem>>, vector<1x16x64xf32>
    %7 = vector.shape_cast %6 : vector<1x16x64xf32> to vector<16x64xf32>
    %c19 = arith.constant 19 : index
    %c0_7 = arith.constant 0 : index
    %8 = vector.load %arg7[%c19, %c0_7] : memref<36x64xf32, #tpu.memory_space<vmem>>, vector<16x64xf32>
    tpu.vector_store %arg7[%c19, %c0_7], %7 {strides = array<i32>} : memref<36x64xf32, #tpu.memory_space<vmem>>, vector<16x64xf32>,
    %cst = arith.constant 0.000000e+00 : f32
    %9 = vector.broadcast %cst : f32 to vector<34x128xf32>
    %c0_8 = arith.constant 0 : index
    %c0_9 = arith.constant 0 : index
    %10 = vector.load %arg7[%c0_8, %c0_9] : memref<36x64xf32, #tpu.memory_space<vmem>>, vector<34x64xf32>
    %11 = arith.truncf %10 : vector<34x64xf32> to vector<34x64xbf16>
    %c0_10 = arith.constant 0 : index
    %c0_11 = arith.constant 0 : index
    %c0_12 = arith.constant 0 : index
    %12 = vector.load %arg2[%c0_10, %c0_11, %c0_12] : memref<3x64x128xbf16, #tpu.memory_space<vmem>>, vector<1x64x128xbf16>
    %13 = vector.shape_cast %12 : vector<1x64x128xbf16> to vector<64x128xbf16>
    %cst_13 = arith.constant dense<0.000000e+00> : vector<34x128xf32>
    %14 = tpu.matmul %11, %13, %cst_13 {dimension_numbers = #tpu.dot_dimension_numbers<[1], [0], [0], [1], [0, 0, 1, 1], [], []>} : vector<34x64xbf16>, vector<64x128xbf16>, vector<34x128xf32> -> vector<34x128xf32>
    %15 = arith.addf %9, %14 : vector<34x128xf32>
    %c1_14 = arith.constant 1 : index
    %c0_15 = arith.constant 0 : index
    %16 = vector.load %arg7[%c1_14, %c0_15] : memref<36x64xf32, #tpu.memory_space<vmem>>, vector<34x64xf32>
    %17 = arith.truncf %16 : vector<34x64xf32> to vector<34x64xbf16>
    %c1_16 = arith.constant 1 : index
    %c0_17 = arith.constant 0 : index
    %c0_18 = arith.constant 0 : index
    %18 = vector.load %arg2[%c1_16, %c0_17, %c0_18] : memref<3x64x128xbf16, #tpu.memory_space<vmem>>, vector<1x64x128xbf16>
    %19 = vector.shape_cast %18 : vector<1x64x128xbf16> to vector<64x128xbf16>
    %cst_19 = arith.constant dense<0.000000e+00> : vector<34x128xf32>
    %20 = tpu.matmul %17, %19, %cst_19 {dimension_numbers = #tpu.dot_dimension_numbers<[1], [0], [0], [1], [0, 0, 1, 1], [], []>} : vector<34x64xbf16>, vector<64x128xbf16>, vector<34x128xf32> -> vector<34x128xf32>
    %21 = arith.addf %15, %20 : vector<34x128xf32>
    %c2 = arith.constant 2 : index
    %c0_20 = arith.constant 0 : index
    %22 = vector.load %arg7[%c2, %c0_20] : memref<36x64xf32, #tpu.memory_space<vmem>>, vector<34x64xf32>
    %23 = arith.truncf %22 : vector<34x64xf32> to vector<34x64xbf16>
    %c2_21 = arith.constant 2 : index
    %c0_22 = arith.constant 0 : index
    %c0_23 = arith.constant 0 : index
    %24 = vector.load %arg2[%c2_21, %c0_22, %c0_23] : memref<3x64x128xbf16, #tpu.memory_space<vmem>>, vector<1x64x128xbf16>
    %25 = vector.shape_cast %24 : vector<1x64x128xbf16> to vector<64x128xbf16>
    %cst_24 = arith.constant dense<0.000000e+00> : vector<34x128xf32>
    %26 = tpu.matmul %23, %25, %cst_24 {dimension_numbers = #tpu.dot_dimension_numbers<[1], [0], [0], [1], [0, 0, 1, 1], [], []>} : vector<34x64xbf16>, vector<64x128xbf16>, vector<34x128xf32> -> vector<34x128xf32>
    %27 = arith.addf %21, %26 : vector<34x128xf32>
    %c0_25 = arith.constant 0 : index
    %c0_26 = arith.constant 0 : index
    %28 = vector.load %arg4[%c0_25, %c0_26] : memref<1x128xf32, #tpu.memory_space<vmem>>, vector<1x128xf32>
    %29 = vector.broadcast %28 : vector<1x128xf32> to vector<34x128xf32>
    %30 = arith.addf %27, %29 : vector<34x128xf32>
    %cst_27 = arith.constant 0.000000e+00 : f32
    %31 = vector.broadcast %cst_27 : f32 to vector<34x128xf32>
    %32 = arith.maximumf %30, %31 : vector<34x128xf32>
    %33 = vector.extract_strided_slice %32 {offsets = [0, 0], sizes = [16, 128], strides = [1, 1]} : vector<34x128xf32> to vector<16x128xf32>
    %c1_28 = arith.constant 1 : index
    %c0_29 = arith.constant 0 : index
    %34 = vector.load %arg8[%c1_28, %c0_29] : memref<36x128xf32, #tpu.memory_space<vmem>>, vector<16x128xf32>
    tpu.vector_store %arg8[%c1_28, %c0_29], %33 {strides = array<i32>} : memref<36x128xf32, #tpu.memory_space<vmem>>, vector<16x128xf32>,
    %35 = vector.extract_strided_slice %32 {offsets = [18, 0], sizes = [16, 128], strides = [1, 1]} : vector<34x128xf32> to vector<16x128xf32>
    %c19_30 = arith.constant 19 : index
    %c0_31 = arith.constant 0 : index
    %36 = vector.load %arg8[%c19_30, %c0_31] : memref<36x128xf32, #tpu.memory_space<vmem>>, vector<16x128xf32>
    tpu.vector_store %arg8[%c19_30, %c0_31], %35 {strides = array<i32>} : memref<36x128xf32, #tpu.memory_space<vmem>>, vector<16x128xf32>,
    %cst_32 = arith.constant 0.000000e+00 : f32
    %37 = vector.broadcast %cst_32 : f32 to vector<34x128xf32>
    %c0_33 = arith.constant 0 : index
    %c0_34 = arith.constant 0 : index
    %38 = vector.load %arg8[%c0_33, %c0_34] : memref<36x128xf32, #tpu.memory_space<vmem>>, vector<34x128xf32>
    %39 = arith.truncf %38 : vector<34x128xf32> to vector<34x128xbf16>
    %c0_35 = arith.constant 0 : index
    %c0_36 = arith.constant 0 : index
    %c0_37 = arith.constant 0 : index
    %40 = vector.load %arg3[%c0_35, %c0_36, %c0_37] : memref<3x128x128xbf16, #tpu.memory_space<vmem>>, vector<1x128x128xbf16>
    %41 = vector.shape_cast %40 : vector<1x128x128xbf16> to vector<128x128xbf16>
    %cst_38 = arith.constant dense<0.000000e+00> : vector<34x128xf32>
    %42 = tpu.matmul %39, %41, %cst_38 {dimension_numbers = #tpu.dot_dimension_numbers<[1], [0], [0], [1], [0, 0, 1, 1], [], []>} : vector<34x128xbf16>, vector<128x128xbf16>, vector<34x128xf32> -> vector<34x128xf32>
    %43 = arith.addf %37, %42 : vector<34x128xf32>
    %c1_39 = arith.constant 1 : index
    %c0_40 = arith.constant 0 : index
    %44 = vector.load %arg8[%c1_39, %c0_40] : memref<36x128xf32, #tpu.memory_space<vmem>>, vector<34x128xf32>
    %45 = arith.truncf %44 : vector<34x128xf32> to vector<34x128xbf16>
    %c1_41 = arith.constant 1 : index
    %c0_42 = arith.constant 0 : index
    %c0_43 = arith.constant 0 : index
    %46 = vector.load %arg3[%c1_41, %c0_42, %c0_43] : memref<3x128x128xbf16, #tpu.memory_space<vmem>>, vector<1x128x128xbf16>
    %47 = vector.shape_cast %46 : vector<1x128x128xbf16> to vector<128x128xbf16>
    %cst_44 = arith.constant dense<0.000000e+00> : vector<34x128xf32>
    %48 = tpu.matmul %45, %47, %cst_44 {dimension_numbers = #tpu.dot_dimension_numbers<[1], [0], [0], [1], [0, 0, 1, 1], [], []>} : vector<34x128xbf16>, vector<128x128xbf16>, vector<34x128xf32> -> vector<34x128xf32>
    %49 = arith.addf %43, %48 : vector<34x128xf32>
    %c2_45 = arith.constant 2 : index
    %c0_46 = arith.constant 0 : index
    %50 = vector.load %arg8[%c2_45, %c0_46] : memref<36x128xf32, #tpu.memory_space<vmem>>, vector<34x128xf32>
    %51 = arith.truncf %50 : vector<34x128xf32> to vector<34x128xbf16>
    %c2_47 = arith.constant 2 : index
    %c0_48 = arith.constant 0 : index
    %c0_49 = arith.constant 0 : index
    %52 = vector.load %arg3[%c2_47, %c0_48, %c0_49] : memref<3x128x128xbf16, #tpu.memory_space<vmem>>, vector<1x128x128xbf16>
    %53 = vector.shape_cast %52 : vector<1x128x128xbf16> to vector<128x128xbf16>
    %cst_50 = arith.constant dense<0.000000e+00> : vector<34x128xf32>
    %54 = tpu.matmul %51, %53, %cst_50 {dimension_numbers = #tpu.dot_dimension_numbers<[1], [0], [0], [1], [0, 0, 1, 1], [], []>} : vector<34x128xbf16>, vector<128x128xbf16>, vector<34x128xf32> -> vector<34x128xf32>
    %55 = arith.addf %49, %54 : vector<34x128xf32>
    %c0_51 = arith.constant 0 : index
    %c0_52 = arith.constant 0 : index
    %56 = vector.load %arg5[%c0_51, %c0_52] : memref<1x128xf32, #tpu.memory_space<vmem>>, vector<1x128xf32>
    %57 = vector.broadcast %56 : vector<1x128xf32> to vector<34x128xf32>
    %58 = arith.addf %55, %57 : vector<34x128xf32>
    %cst_53 = arith.constant 0.000000e+00 : f32
    %59 = vector.broadcast %cst_53 : f32 to vector<34x128xf32>
    %60 = arith.maximumf %58, %59 : vector<34x128xf32>
    %61 = vector.extract_strided_slice %60 {offsets = [0, 0], sizes = [16, 128], strides = [1, 1]} : vector<34x128xf32> to vector<16x128xf32>
    %c0_54 = arith.constant 0 : index
    %c0_55 = arith.constant 0 : index
    %c0_56 = arith.constant 0 : index
    %62 = vector.load %arg6[%c0_54, %c0_55, %c0_56] : memref<2x16x128xf32, #tpu.memory_space<vmem>>, vector<1x16x128xf32>
    %63 = vector.shape_cast %62 : vector<1x16x128xf32> to vector<16x128xf32>
    %64 = vector.shape_cast %61 : vector<16x128xf32> to vector<1x16x128xf32>
    tpu.vector_store %arg6[%c0_54, %c0_55, %c0_56], %64 {strides = array<i32>} : memref<2x16x128xf32, #tpu.memory_space<vmem>>, vector<1x16x128xf32>,
    %65 = vector.extract_strided_slice %60 {offsets = [18, 0], sizes = [16, 128], strides = [1, 1]} : vector<34x128xf32> to vector<16x128xf32>
    %c1_57 = arith.constant 1 : index
    %c0_58 = arith.constant 0 : index
    %c0_59 = arith.constant 0 : index
    %66 = vector.load %arg6[%c1_57, %c0_58, %c0_59] : memref<2x16x128xf32, #tpu.memory_space<vmem>>, vector<1x16x128xf32>
    %67 = vector.shape_cast %66 : vector<1x16x128xf32> to vector<16x128xf32>
    %68 = vector.shape_cast %65 : vector<16x128xf32> to vector<1x16x128xf32>
    tpu.vector_store %arg6[%c1_57, %c0_58, %c0_59], %68 {strides = array<i32>} : memref<2x16x128xf32, #tpu.memory_space<vmem>>, vector<1x16x128xf32>,
    return
  }
  func.func @transform_0(%arg0: i32) -> (i32, i32, i32) {
    %c0_i32 = arith.constant 0 : i32
    %c0_i32_0 = arith.constant 0 : i32
    %c0_i32_1 = arith.constant 0 : i32
    return %arg0, %c0_i32, %c0_i32_0 : i32, i32, i32
  }
  func.func @transform_1(%arg0: i32) -> (i32, i32, i32) {
    %c0_i32 = arith.constant 0 : i32
    %c0_i32_0 = arith.constant 0 : i32
    %c0_i32_1 = arith.constant 0 : i32
    %c0_i32_2 = arith.constant 0 : i32
    return %c0_i32, %c0_i32_0, %c0_i32_1 : i32, i32, i32
  }
  func.func @transform_2(%arg0: i32) -> (i32, i32, i32) {
    %c0_i32 = arith.constant 0 : i32
    %c0_i32_0 = arith.constant 0 : i32
    %c0_i32_1 = arith.constant 0 : i32
    %c0_i32_2 = arith.constant 0 : i32
    return %c0_i32, %c0_i32_0, %c0_i32_1 : i32, i32, i32
  }
  func.func @transform_3(%arg0: i32) -> (i32, i32) {
    %c0_i32 = arith.constant 0 : i32
    %c0_i32_0 = arith.constant 0 : i32
    %c0_i32_1 = arith.constant 0 : i32
    return %c0_i32, %c0_i32_0 : i32, i32
  }
  func.func @transform_4(%arg0: i32) -> (i32, i32) {
    %c0_i32 = arith.constant 0 : i32
    %c0_i32_0 = arith.constant 0 : i32
    %c0_i32_1 = arith.constant 0 : i32
    return %c0_i32, %c0_i32_0 : i32, i32
  }
  func.func @transform_5(%arg0: i32) -> (i32, i32, i32) {
    %c0_i32 = arith.constant 0 : i32
    %c0_i32_0 = arith.constant 0 : i32
    %c0_i32_1 = arith.constant 0 : i32
    return %arg0, %c0_i32, %c0_i32_0 : i32, i32, i32
  }
}

</mosaic_0001>

<bundles_post_ra>
// kernel: tile.13
= control target key start
LH: loop header
LB: loop body
LE: loop exit
PB: predicated region body
PF: predicated region fallthrough
CT: control target
= control target key end

     0   :  { %s28_s0 = inlined_call_operand.vmem [shape: f32[8], index: 0, kind: input, shape index: {}]   ;;  %s29_s1 = inlined_call_operand.vmem [shape: f32[16,8], index: 1, kind: output, shape index: {}]  }
   0x1   :  { %v4_v0 = vld [vmem:[%s28_s0] ss:$0 sm:$0xff] }
   0x2   :  { %5 = vst [vmem:[%s29_s1] sm:$0xff] %v4_v0  ;;  %8 = vst [vmem:[%s29_s1 + $0x8] sm:$0xff] %v4_v0 }

// kernel: tile.14
= control target key start
LH: loop header
LB: loop body
LE: loop exit
PB: predicated region body
PF: predicated region fallthrough
CT: control target
= control target key end

     0   :  { %s131_s10 = smov 120   ;;  %s132_s11 = smov 104   ;;  %vm3_vm0 = vcmask 64512   ;;  %vm9_vm1 = vcmask 1048512   ;;  %vm15_vm2 = vcmask 982912   ;;  %vm21_vm3 = vcmask 917312   ;;  %s207_s0 = inlined_call_operand.vmem [shape: f32[16,8], index: 0, kind: input, shape index: {}]   ;;  %s208_s1 = inlined_call_operand.vmem [shape: f32[1,128], index: 1, kind: output, shape index: {}]  }
   0x1   :  { %v101_v0 = vld [vmem:[%s207_s0 + $0xf] sm:$0x1]   ;;  %v103_v1 = vld [vmem:[%s207_s0 + $0xd] sm:$0x1]   ;;  %v102_v2 = vld [vmem:[%s207_s0 + $0xe] sm:$0x1]  }
   0x2   :  { %7 = vrot.lane.b32.xlu0 %v101_v0, %s131_s10  ;;  %19 = vrot.lane.b32.xlu1 %v103_v1, %s132_s11  ;;  %v104_v3 = vld [vmem:[%s207_s0 + $0xc] sm:$0x1]   ;;  %s133_s16 = smov 112   ;;  %s134_s17 = smov 96   ;;  %v105_v4 = vld [vmem:[%s207_s0 + $0xb] sm:$0x1]  }
   0x3   :  { %v106_v5 = vld [vmem:[%s207_s0 + $0xa] sm:$0x1]   ;;  %v2_v6 = vld [vmem:[%s207_s0] sm:$0x1]   ;;  %s135_s24 = smov 88   ;;  %s136_s25 = smov 80  }
   0x4   :  { %4 = vst.msk [vmem:[#allocation0] sm:$0x1] %vm3_vm0, %v2_v6   ;;  %v107_v7 = vld [vmem:[%s207_s0 + $0x9] sm:$0x1]   ;;  %v108_v8 = vld [vmem:[%s207_s0 + $0x8] sm:$0x1]  }
   0x5   :  { %s137_s30 = smov 72   ;;  %s138_s2 = smov 64   ;;  %v109_v9 = vld [vmem:[%s207_s0 + $0x7] sm:$0x1]   ;;  %v110_v10 = vld [vmem:[%s207_s0 + $0x6] sm:$0x1]  }
   0x6   :  { %13 = vrot.lane.b32.xlu0 %v102_v2, %s133_s16  ;;  %25 = vrot.lane.b32.xlu1 %v104_v3, %s134_s17  ;;  %s139_s7 = smov 56   ;;  %s140_s8 = smov 48   ;;  %v111_v11 = vld [vmem:[%s207_s0 + $0x5] sm:$0x1]   ;;  %v112_v12 = vld [vmem:[%s207_s0 + $0x4] sm:$0x1]  }
   0x7   :  { %s141_s13 = smov 40   ;;  %s142_s14 = smov 32   ;;  %v113_v13 = vld [vmem:[%s207_s0 + $0x3] sm:$0x1]   ;;  %v114_v14 = vld [vmem:[%s207_s0 + $0x2] sm:$0x1]  }
   0x8   :  { %s143_s19 = smov 24   ;;  %s144_s20 = smov 16   ;;  %v115_v15 = vld [vmem:[%s207_s0 + $0x1] sm:$0x1]   ;;  %vm27_vm4 = vcmask 851712   ;;  %vm33_vm5 = vcmask 786112  }
   0x9   :  { %s145_s0 = smov 8   ;;  %vm39_vm6 = vcmask 720512   ;;  %vm45_vm7 = vcmask 654912   ;;  %vm51_vm8 = vcmask 589312   ;;  %vm57_vm9 = vcmask 523712  }
   0xa   :  { %31 = vrot.lane.b32.xlu0 %v105_v4, %s135_s24  ;;  %37 = vrot.lane.b32.xlu1 %v106_v5, %s136_s25  ;;  %vm63_vm10 = vcmask 458112   ;;  %vm69_vm11 = vcmask 392512   ;;  %vm75_vm12 = vcmask 326912   ;;  %vm81_vm13 = vcmask 261312  }
   0xb   :  { %vm87_vm14 = vcmask 195712   ;;  %vm93_vm15 = vcmask 130112  }
   0xe   :  { %43 = vrot.lane.b32.xlu0 %v107_v7, %s137_s30  ;;  %49 = vrot.lane.b32.xlu1 %v108_v8, %s138_s2 }
  0x12   :  { %55 = vrot.lane.b32.xlu0 %v109_v9, %s139_s7  ;;  %61 = vrot.lane.b32.xlu1 %v110_v10, %s140_s8 }
  0x16   :  { %67 = vrot.lane.b32.xlu0 %v111_v11, %s141_s13  ;;  %73 = vrot.lane.b32.xlu1 %v112_v12, %s142_s14 }
  0x1a   :  { %79 = vrot.lane.b32.xlu0 %v113_v13, %s143_s19  ;;  %85 = vrot.lane.b32.xlu1 %v114_v14, %s144_s20 }
  0x1e   :  { %91 = vrot.lane.b32.xlu0 %v115_v15, %s145_s0 }
  0x74   :  { %v8_v16 = vpop.permute.xlu0 %7   ;;  %v20_v17 = vpop.permute.xlu1 %19  }
  0x75   :  { %10 = vst.msk [vmem:[#allocation0] sm:$0x1] %vm9_vm1, %v8_v16  }
  0x78   :  { %v14_v18 = vpop.permute.xlu0 %13   ;;  %v26_v19 = vpop.permute.xlu1 %25  }
  0x79   :  { %16 = vst.msk [vmem:[#allocation0] sm:$0x1] %vm15_vm2, %v14_v18  }
  0x7a   :  { %22 = vst.msk [vmem:[#allocation0] sm:$0x1] %vm21_vm3, %v20_v17  }
  0x7b   :  { %28 = vst.msk [vmem:[#allocation0] sm:$0x1] %vm27_vm4, %v26_v19  }
  0x7c   :  { %v32_v20 = vpop.permute.xlu0 %31   ;;  %v38_v21 = vpop.permute.xlu1 %37  }
  0x7d   :  { %34 = vst.msk [vmem:[#allocation0] sm:$0x1] %vm33_vm5, %v32_v20  }
  0x7e   :  { %40 = vst.msk [vmem:[#allocation0] sm:$0x1] %vm39_vm6, %v38_v21  }
  0x80   :  { %v44_v22 = vpop.permute.xlu0 %43   ;;  %v50_v23 = vpop.permute.xlu1 %49  }
  0x81   :  { %46 = vst.msk [vmem:[#allocation0] sm:$0x1] %vm45_vm7, %v44_v22  }
  0x82   :  { %52 = vst.msk [vmem:[#allocation0] sm:$0x1] %vm51_vm8, %v50_v23  }
  0x84   :  { %v56_v24 = vpop.permute.xlu0 %55   ;;  %v62_v25 = vpop.permute.xlu1 %61  }
  0x85   :  { %58 = vst.msk [vmem:[#allocation0] sm:$0x1] %vm57_vm9, %v56_v24  }
  0x86   :  { %64 = vst.msk [vmem:[#allocation0] sm:$0x1] %vm63_vm10, %v62_v25  }
  0x88   :  { %v68_v26 = vpop.permute.xlu0 %67   ;;  %v74_v27 = vpop.permute.xlu1 %73  }
  0x89   :  { %70 = vst.msk [vmem:[#allocation0] sm:$0x1] %vm69_vm11, %v68_v26  }
  0x8a   :  { %76 = vst.msk [vmem:[#allocation0] sm:$0x1] %vm75_vm12, %v74_v27  }
  0x8c   :  { %v80_v28 = vpop.permute.xlu0 %79   ;;  %v86_v29 = vpop.permute.xlu1 %85  }
  0x8d   :  { %82 = vst.msk [vmem:[#allocation0] sm:$0x1] %vm81_vm13, %v80_v28  }
  0x8e   :  { %88 = vst.msk [vmem:[#allocation0] sm:$0x1] %vm87_vm14, %v86_v29  }
  0x90   :  { %v92_v30 = vpop.permute.xlu0 %91  }
  0x91   :  { %94 = vst.msk [vmem:[#allocation0] sm:$0x1] %vm93_vm15, %v92_v30  }
  0x98   :  { %v98_v31 = vld [vmem:[#allocation0] sm:$0x1] }
  0x99   :  { %100 = vst [vmem:[%s208_s1] sm:$0x1] %v98_v31 }

// kernel: conv_block_forward.1
= control target key start
LH: loop header
LB: loop body
LE: loop exit
PB: predicated region body
PF: predicated region fallthrough
CT: control target
= control target key end

     0   :  { %vm25_vm0 = vcmask 523264   ;;  %vm30_vm1 = vcmask 519168   ;;  %v1145_v0 = vmov 0.0   ;;  %vm1146_vm2 = vmmov 0   ;;  %s1417_s1 = inlined_call_operand.vmem [shape: bf16[3,64,128], index: 1, kind: input, shape index: {}]   ;;  %s1418_s0 = inlined_call_operand.vmem [shape: f32[2,16,64], index: 0, kind: input, shape index: {}]   ;;  %s1419_s2 = inlined_call_operand.vmem [shape: bf16[3,128,128], index: 2, kind: input, shape index: {}]   ;;  %s1420_s3 = inlined_call_operand.vmem [shape: f32[1,128], index: 3, kind: input, shape index: {}]   ;;  %s1421_s4 = inlined_call_operand.vmem [shape: f32[1,128], index: 4, kind: input, shape index: {}]   ;;  %s1422_s5 = inlined_call_operand.vmem [shape: f32[2,16,128], index: 5, kind: output, shape index: {}]  }
   0x1   :  { %963 = vmatprep.subr.bf16.mxu0 %v1145_v0  ;;  %32 = vst [vmem:[#allocation3] sm:$0xff] %v1145_v0  ;;  %33 = vst [vmem:[#allocation3 + $0x8] sm:$0xff] %v1145_v0  ;;  %983 = vmatprep.subr.bf16.mxu1 %v1145_v0  ;;  %v1109_v1 = vld [vmem:[%s1417_s1 + $0x20] sm:$0xff]   ;;  %v1111_v3 = vld [vmem:[%s1417_s1 + $0x28] sm:$0xff]  }
   0x2   :  { %34 = vst [vmem:[#allocation3 + $0x10] sm:$0xff] %v1145_v0  ;;  %35 = vst [vmem:[#allocation3 + $0x18] sm:$0xff] %v1145_v0  ;;  %v1110_v2 = vld [vmem:[%s1417_s1] sm:$0xff]   ;;  %971 = vmatprep.mubr.msk.bf16.mxu0 %vm1146_vm2, %v1145_v0  ;;  %991 = vmatprep.mubr.msk.bf16.mxu1 %vm1146_vm2, %v1145_v0  ;;  %v1112_v4 = vld [vmem:[%s1417_s1 + $0x8] sm:$0xff]  }
   0x3   :  { %36 = vst [vmem:[#allocation3 + $0x20] sm:$0xf] %v1145_v0  ;;  %26 = vst.msk [vmem:[#allocation2] sm:$0xff] %vm25_vm0, %v1145_v0  ;;  %964 = vmatpush3.bf16.msra.mxu0 %v1109_v1  ;;  %984 = vmatpush3.bf16.msra.mxu1 %v1110_v2  ;;  %v1113_v5 = vld [vmem:[%s1417_s1 + $0x30] sm:$0xff]   ;;  %v37_v7 = vld [vmem:[%s1418_s0] sm:$0xff] }
   0x4   :  { %27 = vst.msk [vmem:[#allocation2 + $0x8] sm:$0xff] %vm25_vm0, %v1145_v0  ;;  %28 = vst.msk [vmem:[#allocation2 + $0x10] sm:$0xff] %vm25_vm0, %v1145_v0  ;;  %965 = vmatprep.subr.bf16.mxu0 %v1145_v0  ;;  %985 = vmatprep.subr.bf16.mxu1 %v1145_v0  ;;  %v1114_v6 = vld [vmem:[%s1417_s1 + $0x10] sm:$0xff]   ;;  %v38_v8 = vld [vmem:[%s1418_s0 + $0x8] sm:$0xff] }
   0x5   :  { %29 = vst.msk [vmem:[#allocation2 + $0x18] sm:$0xff] %vm25_vm0, %v1145_v0  ;;  %v1115_v9 = vld [vmem:[%s1417_s1 + $0x38] sm:$0xff]   ;;  %40 = vst.msk [vmem:[#allocation2 + $0x1] sm:$0xff] %vm25_vm0, %v37_v7  ;;  %v809_v11 = vld [vmem:[%s1418_s0 + $0x10] sm:$0xff] }
   0x6   :  { %31 = vst.msk [vmem:[#allocation2 + $0x20] sm:$0xf] %vm30_vm1, %v1145_v0  ;;  %v1116_v10 = vld [vmem:[%s1417_s1 + $0x18] sm:$0xff]   ;;  %v1117_v13 = vld [vmem:[%s1417_s1 + $0x40] sm:$0xff]   ;;  %v1118_v20 = vld [vmem:[%s1417_s1 + $0x48] sm:$0xff]  }
   0x7   :  { %966 = vmatpush3.bf16.msra.mxu0 %v1111_v3  ;;  %986 = vmatpush3.bf16.msra.mxu1 %v1112_v4  ;;  %41 = vst.msk [vmem:[#allocation2 + $0x9] sm:$0xff] %vm25_vm0, %v38_v8  ;;  %v810_v12 = vld [vmem:[%s1418_s0 + $0x18] sm:$0xff]  ;;  %45 = vst.msk [vmem:[#allocation2 + $0x13] sm:$0xff] %vm25_vm0, %v809_v11  ;;  %v1119_v27 = vld [vmem:[%s1417_s1 + $0x50] sm:$0xff]  }
   0x8   :  { %967 = vmatprep.subr.bf16.mxu0 %v1145_v0  ;;  %987 = vmatprep.subr.bf16.mxu1 %v1145_v0  ;;  %46 = vst.msk [vmem:[#allocation2 + $0x1b] sm:$0xff] %vm25_vm0, %v810_v12  ;;  %v1120_v29 = vld [vmem:[%s1417_s1 + $0x58] sm:$0xff]   ;;  %v1121_v41 = vld [vmem:[%s1419_s2 + $0x40] sm:$0xff]   ;;  %v1123_v42 = vld [vmem:[%s1419_s2 + $0x48] sm:$0xff]  }
   0x9   :  { %v1125_v43 = vld [vmem:[%s1419_s2 + $0x50] sm:$0xff]   ;;  %v1122_v44 = vld [vmem:[%s1419_s2] sm:$0xff]   ;;  %v1127_v45 = vld [vmem:[%s1419_s2 + $0x58] sm:$0xff]  }
   0xa   :  { %v1124_v46 = vld [vmem:[%s1419_s2 + $0x8] sm:$0xff]   ;;  %v1129_v47 = vld [vmem:[%s1419_s2 + $0x60] sm:$0xff]   ;;  %v1126_v48 = vld [vmem:[%s1419_s2 + $0x10] sm:$0xff]  }
   0xb   :  { %968 = vmatpush3.bf16.msra.mxu0 %v1113_v5  ;;  %988 = vmatpush3.bf16.msra.mxu1 %v1114_v6  ;;  %v1131_v49 = vld [vmem:[%s1419_s2 + $0x68] sm:$0xff]   ;;  %v1128_v50 = vld [vmem:[%s1419_s2 + $0x18] sm:$0xff]   ;;  %v1133_v51 = vld [vmem:[%s1419_s2 + $0x70] sm:$0xff]  }
   0xc   :  { %969 = vmatprep.subr.bf16.mxu0 %v1145_v0  ;;  %989 = vmatprep.subr.bf16.mxu1 %v1145_v0  ;;  %v63_v14 = vld [vmem:[#allocation2 + $0x1] sm:$0xff]  ;;  %v1135_v53 = vld [vmem:[%s1419_s2 + $0x78] sm:$0xff]   ;;  %v1134_v55 = vld [vmem:[%s1419_s2 + $0x30] sm:$0xff]  }
   0xd   :  { %v47_v16 = vld [vmem:[#allocation2] sm:$0xff]  ;;  %v1132_v54 = vld [vmem:[%s1419_s2 + $0x28] sm:$0xff]   ;;  %v1136_v56 = vld [vmem:[%s1419_s2 + $0x38] sm:$0xff]  }
   0xe   :  { %v64_v15 = vld [vmem:[#allocation2 + $0x9] sm:$0xff]  ;;  %v65_v21 = vld [vmem:[#allocation2 + $0x11] sm:$0xff]  ;;  %v1130_v52 = vld [vmem:[%s1419_s2 + $0x20] sm:$0xff]  }
   0xf   :  { %970 = vmatpush3.bf16.msra.mxu0 %v1115_v9  ;;  %990 = vmatpush3.bf16.msra.mxu1 %v1116_v10  ;;  %v68_v17 = vpack.c.bf16 %v64_v15, %v63_v14  ;;  %v48_v18 = vld [vmem:[#allocation2 + $0x8] sm:$0xff]  ;;  %v66_v22 = vld [vmem:[#allocation2 + $0x19] sm:$0xff]  ;;  %v49_v23 = vld [vmem:[#allocation2 + $0x10] sm:$0xff] }
  0x10   :  { %1003 = vmatprep.subr.bf16.mxu0 %v1145_v0  ;;  %1023 = vmatprep.subr.bf16.mxu1 %v1145_v0  ;;  %v52_v19 = vpack.c.bf16 %v48_v18, %v47_v16  ;;  %v50_v24 = vld [vmem:[#allocation2 + $0x18] sm:$0xff]  ;;  %v69_v25 = vpack.c.bf16 %v66_v22, %v65_v21  ;;  %v67_v28 = vld [vmem:[#allocation2 + $0x21] sm:$0x3]  ;;  %v259_v34 = vld [vmem:[#allocation2 + $0xa] sm:$0xff] }
  0x11   :  { %v53_v26 = vpack.c.bf16 %v50_v24, %v49_v23  ;;  %v51_v30 = vld [vmem:[#allocation2 + $0x20] sm:$0x3]  ;;  %v70_v31 = vpack.c.bf16 %v67_v28, %v67_v28  ;;  %v258_v33 = vld [vmem:[#allocation2 + $0x2] sm:$0xff]  ;;  %v260_v36 = vld [vmem:[#allocation2 + $0x12] sm:$0xff] }
  0x12   :  { %972 = vmatmul.mubr.msk.bf16.vlgmr.msra.gmra.mrb[0].mxu0 %vm25_vm0, %v68_v17  ;;  %992 = vmatmul.mubr.msk.bf16.vlgmr.msra.gmra.mrb[0].mxu1 %vm25_vm0, %v52_v19  ;;  %v54_v32 = vpack.c.bf16 %v51_v30, %v51_v30  ;;  %v263_v35 = vpack.c.bf16 %v259_v34, %v258_v33  ;;  %v261_v37 = vld [vmem:[#allocation2 + $0x1a] sm:$0xff]  ;;  %v262_v39 = vld [vmem:[#allocation2 + $0x22] sm:$0x3] }
  0x13   :  { %1004 = vmatpush3.bf16.msra.mxu0 %v1117_v13  ;;  %975 = vmatprep.mubr.msk.bf16.mxu0 %vm1146_vm2, %v1145_v0  ;;  %v264_v38 = vpack.c.bf16 %v261_v37, %v260_v36  ;;  %v265_v40 = vpack.c.bf16 %v262_v39, %v262_v39  ;;  %v848_v24 = vld [vmem:[%s1420_s3] ss:$0 sm:$0xff] }
  0x14   :  { %1005 = vmatprep.subr.bf16.mxu0 %v1145_v0  ;;  %995 = vmatprep.mubr.msk.bf16.mxu1 %vm1146_vm2, %v1145_v0 }
  0x15   :  { %1024 = vmatpush3.bf16.msra.mxu1 %v1121_v41 }
  0x16   :  { %1025 = vmatprep.subr.bf16.mxu1 %v1145_v0 }
  0x17   :  { %1006 = vmatpush3.bf16.msra.mxu0 %v1118_v20 }
  0x18   :  { %1007 = vmatprep.subr.bf16.mxu0 %v1145_v0 }
  0x19   :  { %1026 = vmatpush3.bf16.msra.mxu1 %v1123_v42 }
  0x1a   :  { %976 = vmatmul.mubr.msk.bf16.gmra.mrb[4].mxu0 %vm25_vm0, %v69_v25  ;;  %996 = vmatmul.mubr.msk.bf16.gmra.mrb[4].mxu1 %vm25_vm0, %v53_v26 }
  0x1b   :  { %1008 = vmatpush3.bf16.msra.mxu0 %v1119_v27  ;;  %979 = vmatprep.mubr.msk.bf16.mxu0 %vm1146_vm2, %v1145_v0 }
  0x1c   :  { %999 = vmatprep.mubr.msk.bf16.mxu1 %vm1146_vm2, %v1145_v0  ;;  %1009 = vmatprep.subr.bf16.mxu0 %v1145_v0 }
  0x1d   :  { %1027 = vmatprep.subr.bf16.mxu1 %v1145_v0 }
  0x1e   :  { %1028 = vmatpush3.bf16.msra.mxu1 %v1125_v43  ;;  %v1138_v43 = vld [vmem:[%s1419_s2 + $0x88] sm:$0xff]  }
  0x1f   :  { %1010 = vmatpush3.bf16.msra.mxu0 %v1120_v29  ;;  %1029 = vmatprep.subr.bf16.mxu1 %v1145_v0 }
  0x20   :  { %1051 = vmatprep.subr.bf16.mxu0 %v1145_v0 }
  0x22   :  { %980 = vmatmul.mubr.msk.bf16.gmra.mrb[8].mxu0 %vm25_vm0, %v70_v31  ;;  %1000 = vmatmul.mubr.msk.bf16.gmra.mrb[8].mxu1 %vm25_vm0, %v54_v32 }
  0x23   :  { %1011 = vmatprep.mubr.msk.bf16.mxu0 %vm1146_vm2, %v1145_v0  ;;  %1039 = vmatprep.mubr.msk.bf16.mxu1 %vm1146_vm2, %v1145_v0 }
  0x24   :  { %1030 = vmatpush3.bf16.msra.mxu1 %v1127_v45 }
  0x25   :  { %1031 = vmatprep.subr.bf16.mxu1 %v1145_v0 }
  0x28   :  { %1032 = vmatpush3.bf16.msra.mxu1 %v1129_v47 }
  0x29   :  { %1033 = vmatprep.subr.bf16.mxu1 %v1145_v0 }
  0x2a   :  { %1012 = vmatmul.mubr.msk.bf16.vlgmr.msra.gmra.mrb[12].mxu0 %vm25_vm0, %v263_v35  ;;  %v1137_v35 = vld [vmem:[%s1419_s2 + $0x80] sm:$0xff]  }
  0x2b   :  { %1015 = vmatprep.mubr.msk.bf16.mxu0 %vm1146_vm2, %v1145_v0  ;;  %1052 = vmatpush3.bf16.msra.mxu0 %v1122_v44 }
  0x2c   :  { %1053 = vmatprep.subr.bf16.mxu0 %v1145_v0  ;;  %1034 = vmatpush3.bf16.msra.mxu1 %v1131_v49 }
  0x2d   :  { %1035 = vmatprep.subr.bf16.mxu1 %v1145_v0 }
  0x2f   :  { %1054 = vmatpush3.bf16.msra.mxu0 %v1124_v46 }
  0x30   :  { %1055 = vmatprep.subr.bf16.mxu0 %v1145_v0  ;;  %1036 = vmatpush3.bf16.msra.mxu1 %v1133_v51 }
  0x31   :  { %1037 = vmatprep.subr.bf16.mxu1 %v1145_v0 }
  0x32   :  { %1016 = vmatmul.mubr.msk.bf16.gmra.mrb[16].mxu0 %vm25_vm0, %v264_v38 }
  0x33   :  { %1019 = vmatprep.mubr.msk.bf16.mxu0 %vm1146_vm2, %v1145_v0  ;;  %1056 = vmatpush3.bf16.msra.mxu0 %v1126_v48 }
  0x34   :  { %1057 = vmatprep.subr.bf16.mxu0 %v1145_v0  ;;  %1038 = vmatpush3.bf16.msra.mxu1 %v1135_v53 }
  0x35   :  { %1079 = vmatprep.subr.bf16.mxu1 %v1145_v0 }
  0x37   :  { %1058 = vmatpush3.bf16.msra.mxu0 %v1128_v50  ;;  %v1139_v50 = vld [vmem:[%s1419_s2 + $0x90] sm:$0xff]  }
  0x38   :  { %1059 = vmatprep.subr.bf16.mxu0 %v1145_v0 }
  0x3a   :  { %1020 = vmatmul.mubr.msk.bf16.gmra.mrb[20].mxu0 %vm25_vm0, %v265_v40 }
  0x3b   :  { %1067 = vmatprep.mubr.msk.bf16.mxu0 %vm1146_vm2, %v1145_v0  ;;  %1060 = vmatpush3.bf16.msra.mxu0 %v1130_v52 }
  0x3c   :  { %1061 = vmatprep.subr.bf16.mxu0 %v1145_v0 }
  0x3f   :  { %1062 = vmatpush3.bf16.msra.mxu0 %v1132_v54 }
  0x40   :  { %1063 = vmatprep.subr.bf16.mxu0 %v1145_v0 }
  0x43   :  { %1064 = vmatpush3.bf16.msra.mxu0 %v1134_v55 }
  0x44   :  { %1065 = vmatprep.subr.bf16.mxu0 %v1145_v0 }
  0x47   :  { %1066 = vmatpush3.bf16.msra.mxu0 %v1136_v56 }
  0xe5   :  { %v147_v57 = vpop.f32.mrb[0].mxu0  ;;  %v236_v58 = vpop.f32.mrb[0].mxu1 }
  0xe6   :  { %v973_v59 = vpop.f32.mrb[1].mxu0  ;;  %v237_v60 = vadd.f32 %v236_v58, %v147_v57  ;;  %v993_v61 = vpop.f32.mrb[1].mxu1  ;;  %v1140_v57 = vld [vmem:[%s1419_s2 + $0x98] sm:$0xff]  }
  0xe7   :  { %v150_v62 = vpop.f32.mrb[2].mxu0  ;;  %v239_v63 = vpop.f32.mrb[2].mxu1 }
  0xe8   :  { %v974_v1 = vpop.f32.mrb[3].mxu0  ;;  %v240_v2 = vadd.f32 %v239_v63, %v150_v62  ;;  %v994_v3 = vpop.f32.mrb[3].mxu1  ;;  %v1141_v63 = vld [vmem:[%s1419_s2 + $0xa0] sm:$0xff]  }
  0xed   :  { %v155_v4 = vpop.f32.mrb[4].mxu0  ;;  %v244_v5 = vpop.f32.mrb[4].mxu1 }
  0xee   :  { %v977_v6 = vpop.f32.mrb[5].mxu0  ;;  %v245_v7 = vadd.f32 %v244_v5, %v155_v4  ;;  %v997_v8 = vpop.f32.mrb[5].mxu1 }
  0xef   :  { %v158_v9 = vpop.f32.mrb[6].mxu0  ;;  %v247_v10 = vpop.f32.mrb[6].mxu1  ;;  %v1143_v6 = vld [vmem:[%s1419_s2 + $0xb0] sm:$0xff]   ;;  %v1144_v8 = vld [vmem:[%s1419_s2 + $0xb8] sm:$0xff]  }
  0xf0   :  { %v978_v11 = vpop.f32.mrb[7].mxu0  ;;  %v248_v12 = vadd.f32 %v247_v10, %v158_v9  ;;  %v998_v13 = vpop.f32.mrb[7].mxu1 }
  0xf5   :  { %v163_v14 = vpop.f32.mrb[8].mxu0  ;;  %v252_v16 = vpop.f32.mrb[8].mxu1 }
  0xf6   :  { %v981_v15 = vpop.f32.mrb[9].mxu0  ;;  %v253_v17 = vadd.f32 %v252_v16, %v163_v14  ;;  %v1001_v19 = vpop.f32.mrb[9].mxu1 }
  0xf7   :  { %v166_v18 = vpop.f32.mrb[10].mxu0  ;;  %v255_v21 = vpop.f32.mrb[10].mxu1 }
  0xf8   :  { %v982_v20 = vpop.f32.mrb[11].mxu0  ;;  %v1002_v22 = vpop.f32.mrb[11].mxu1 }
  0xfd   :  { %v342_v23 = vpop.f32.mrb[12].mxu0 }
  0xfe   :  { %v364_v25 = vadd.f32 %v342_v23, %v237_v60  ;;  %v1013_v26 = vpop.f32.mrb[13].mxu0 }
  0xff   :  { %v345_v27 = vpop.f32.mrb[14].mxu0 }
 0x100   :  { %v376_v28 = vadd.f32 %v848_v24, %v364_v25  ;;  %v365_v29 = vadd.f32 %v345_v27, %v240_v2  ;;  %v1014_v30 = vpop.f32.mrb[15].mxu0  ;;  %v1142_v2 = vld [vmem:[%s1419_s2 + $0xa8] sm:$0xff]  }
 0x102   :  { %v381_v31 = vmax.f32 %v376_v28, 0.0  ;;  %v377_v32 = vadd.f32 %v848_v24, %v365_v29 }
 0x104   :  { %386 = vst [vmem:[#allocation3 + $0x1] sm:$0xff] %v381_v31  ;;  %v382_v33 = vmax.f32 %v377_v32, 0.0 }
 0x105   :  { %v350_v34 = vpop.f32.mrb[16].mxu0 }
 0x106   :  { %387 = vst [vmem:[#allocation3 + $0x9] sm:$0xff] %v382_v33  ;;  %v366_v36 = vadd.f32 %v350_v34, %v245_v7  ;;  %v1017_v37 = vpop.f32.mrb[17].mxu0  ;;  %v420_v38 = vpack.c.bf16 %v382_v33, %v381_v31 }
 0x107   :  { %v353_v39 = vpop.f32.mrb[18].mxu0 }
 0x108   :  { %v378_v40 = vadd.f32 %v848_v24, %v366_v36  ;;  %v367_v41 = vadd.f32 %v353_v39, %v248_v12  ;;  %v1018_v42 = vpop.f32.mrb[19].mxu0  ;;  %1040 = vmatmul.mubr.bf16.vlgmr.msra.gmra.mrb[12].mxu1 %v420_v38 }
 0x109   :  { %1080 = vmatpush3.bf16.msra.mxu1 %v1137_v35  ;;  %1043 = vmatprep.mubr.msk.bf16.mxu1 %vm1146_vm2, %v1145_v0 }
 0x10a   :  { %v383_v44 = vmax.f32 %v378_v40, 0.0  ;;  %v379_v45 = vadd.f32 %v848_v24, %v367_v41  ;;  %1081 = vmatprep.subr.bf16.mxu1 %v1145_v0 }
 0x10b   :  { %v391_v48 = vld [vmem:[#allocation3] sm:$0xff] }
 0x10c   :  { %388 = vst [vmem:[#allocation3 + $0x11] sm:$0xfc] %v383_v44  ;;  %v384_v46 = vmax.f32 %v379_v45, 0.0 }
 0x10d   :  { %v358_v47 = vpop.f32.mrb[20].mxu0  ;;  %v392_v49 = vld [vmem:[#allocation3 + $0x8] sm:$0xff]  ;;  %1082 = vmatpush3.bf16.msra.mxu1 %v1138_v43 }
 0x10e   :  { %389 = vst [vmem:[#allocation3 + $0x19] sm:$0xff] %v384_v46  ;;  %v368_v51 = vadd.f32 %v358_v47, %v253_v17  ;;  %v396_v52 = vpack.c.bf16 %v392_v49, %v391_v48  ;;  %v1021_v53 = vpop.f32.mrb[21].mxu0  ;;  %1083 = vmatprep.subr.bf16.mxu1 %v1145_v0  ;;  %v648_v9 = vld [vmem:[#allocation3 + $0x2] sm:$0xff]  ;;  %v649_v10 = vld [vmem:[#allocation3 + $0xa] sm:$0xff] }
 0x10f   :  { %v361_v54 = vpop.f32.mrb[22].mxu0  ;;  %v653_v11 = vpack.c.bf16 %v649_v10, %v648_v9 }
 0x110   :  { %v380_v55 = vadd.f32 %v848_v24, %v368_v51  ;;  %1068 = vmatmul.mubr.bf16.vlgmr.msra.gmra.mrb[24].mxu0 %v396_v52  ;;  %v1022_v56 = vpop.f32.mrb[23].mxu0 }
 0x111   :  { %1071 = vmatprep.mubr.msk.bf16.mxu0 %vm1146_vm2, %v1145_v0  ;;  %1084 = vmatpush3.bf16.msra.mxu1 %v1139_v50 }
 0x112   :  { %v385_v58 = vmax.f32 %v380_v55, 0.0  ;;  %1085 = vmatprep.subr.bf16.mxu1 %v1145_v0 }
 0x113   :  { %v417_v59 = vld [vmem:[#allocation3 + $0x11] sm:$0xff] }
 0x114   :  { %390 = vst [vmem:[#allocation3 + $0x21] sm:$0x3] %v385_v58  ;;  %v421_v60 = vpack.c.bf16 %v384_v46, %v417_v59  ;;  %v393_v61 = vld [vmem:[#allocation3 + $0x10] sm:$0xff]  ;;  %v905_v46 = vld [vmem:[%s1421_s4] ss:$0 sm:$0xff] }
 0x115   :  { %v394_v62 = vld [vmem:[#allocation3 + $0x18] sm:$0xff]  ;;  %1086 = vmatpush3.bf16.msra.mxu1 %v1140_v57 }
 0x116   :  { %1044 = vmatmul.mubr.bf16.gmra.mrb[16].mxu1 %v421_v60  ;;  %v397_v1 = vpack.c.bf16 %v394_v62, %v393_v61  ;;  %1087 = vmatprep.subr.bf16.mxu1 %v1145_v0  ;;  %v650_v13 = vld [vmem:[#allocation3 + $0x12] sm:$0xff] }
 0x117   :  { %1047 = vmatprep.mubr.msk.bf16.mxu1 %vm1146_vm2, %v1145_v0 }
 0x118   :  { %1072 = vmatmul.mubr.bf16.gmra.mrb[28].mxu0 %v397_v1 }
 0x119   :  { %1075 = vmatprep.mubr.msk.bf16.mxu0 %vm1146_vm2, %v1145_v0  ;;  %1088 = vmatpush3.bf16.msra.mxu1 %v1141_v63 }
 0x11a   :  { %1089 = vmatprep.subr.bf16.mxu1 %v1145_v0 }
 0x11b   :  { %v419_v3 = vld [vmem:[#allocation3 + $0x21] sm:$0x3] }
 0x11c   :  { %v395_v4 = vld [vmem:[#allocation3 + $0x20] sm:$0x3]  ;;  %v422_v5 = vpack.c.bf16 %v419_v3, %v419_v3  ;;  %v652_v15 = vld [vmem:[#allocation3 + $0x22] sm:$0x3] }
 0x11d   :  { %1090 = vmatpush3.bf16.msra.mxu1 %v1142_v2  ;;  %v398_v7 = vpack.c.bf16 %v395_v4, %v395_v4  ;;  %v651_v12 = vld [vmem:[#allocation3 + $0x1a] sm:$0xff]  ;;  %v655_v16 = vpack.c.bf16 %v652_v15, %v652_v15 }
 0x11e   :  { %1048 = vmatmul.mubr.bf16.gmra.mrb[20].mxu1 %v422_v5  ;;  %1091 = vmatprep.subr.bf16.mxu1 %v1145_v0  ;;  %v654_v14 = vpack.c.bf16 %v651_v12, %v650_v13 }
 0x11f   :  { %1095 = vmatprep.mubr.msk.bf16.mxu1 %vm1146_vm2, %v1145_v0 }
 0x120   :  { %1076 = vmatmul.mubr.bf16.gmra.mrb[32].mxu0 %v398_v7 }
 0x121   :  { %1092 = vmatpush3.bf16.msra.mxu1 %v1143_v6 }
 0x122   :  { %1093 = vmatprep.subr.bf16.mxu1 %v1145_v0 }
 0x125   :  { %1094 = vmatpush3.bf16.msra.mxu1 %v1144_v8 }
 0x128   :  { %1096 = vmatmul.mubr.bf16.vlgmr.msra.gmra.mrb[24].mxu1 %v653_v11 }
 0x129   :  { %1099 = vmatprep.mubr.msk.bf16.mxu1 %vm1146_vm2, %v1145_v0 }
 0x130   :  { %1100 = vmatmul.mubr.bf16.gmra.mrb[28].mxu1 %v654_v14 }
 0x131   :  { %1103 = vmatprep.mubr.msk.bf16.mxu1 %vm1146_vm2, %v1145_v0 }
 0x138   :  { %1104 = vmatmul.mubr.bf16.gmra.mrb[32].mxu1 %v655_v16 }
 0x1db   :  { %v522_v17 = vpop.f32.mrb[12].mxu1 }
 0x1dc   :  { %v1041_v18 = vpop.f32.mrb[13].mxu1 }
 0x1dd   :  { %v525_v19 = vpop.f32.mrb[14].mxu1 }
 0x1de   :  { %v1042_v20 = vpop.f32.mrb[15].mxu1 }
 0x1e3   :  { %v626_v21 = vpop.f32.mrb[24].mxu0 }
 0x1e4   :  { %v627_v22 = vadd.f32 %v626_v21, %v522_v17  ;;  %v1069_v23 = vpop.f32.mrb[25].mxu0 }
 0x1e5   :  { %v629_v24 = vpop.f32.mrb[26].mxu0 }
 0x1e6   :  { %v630_v25 = vadd.f32 %v629_v24, %v525_v19  ;;  %v1070_v26 = vpop.f32.mrb[27].mxu0 }
 0x1e9   :  { %v530_v27 = vpop.f32.mrb[16].mxu1 }
 0x1ea   :  { %v1045_v28 = vpop.f32.mrb[17].mxu1 }
 0x1eb   :  { %v634_v29 = vpop.f32.mrb[28].mxu0  ;;  %v533_v30 = vpop.f32.mrb[18].mxu1 }
 0x1ec   :  { %v635_v31 = vadd.f32 %v634_v29, %v530_v27  ;;  %v1073_v32 = vpop.f32.mrb[29].mxu0  ;;  %v1046_v0 = vpop.f32.mrb[19].mxu1 }
 0x1ed   :  { %v637_v33 = vpop.f32.mrb[30].mxu0 }
 0x1ee   :  { %v638_v34 = vadd.f32 %v637_v33, %v533_v30  ;;  %v1074_v35 = vpop.f32.mrb[31].mxu0 }
 0x1f1   :  { %v538_v36 = vpop.f32.mrb[20].mxu1 }
 0x1f2   :  { %v1049_v37 = vpop.f32.mrb[21].mxu1 }
 0x1f3   :  { %v642_v38 = vpop.f32.mrb[32].mxu0  ;;  %v541_v39 = vpop.f32.mrb[22].mxu1 }
 0x1f4   :  { %v643_v40 = vadd.f32 %v642_v38, %v538_v36  ;;  %v1077_v41 = vpop.f32.mrb[33].mxu0  ;;  %v1050_v42 = vpop.f32.mrb[23].mxu1 }
 0x1f5   :  { %v645_v43 = vpop.f32.mrb[34].mxu0 }
 0x1f6   :  { %v1078_v44 = vpop.f32.mrb[35].mxu0 }
 0x1fb   :  { %v755_v45 = vpop.f32.mrb[24].mxu1 }
 0x1fc   :  { %v777_v47 = vadd.f32 %v755_v45, %v627_v22  ;;  %v1097_v48 = vpop.f32.mrb[25].mxu1 }
 0x1fd   :  { %v758_v49 = vpop.f32.mrb[26].mxu1 }
 0x1fe   :  { %v789_v50 = vadd.f32 %v905_v46, %v777_v47  ;;  %v778_v51 = vadd.f32 %v758_v49, %v630_v25  ;;  %v1098_v52 = vpop.f32.mrb[27].mxu1 }
 0x200   :  { %v794_v53 = vmax.f32 %v789_v50, 0.0  ;;  %v790_v54 = vadd.f32 %v905_v46, %v778_v51 }
 0x202   :  { %799 = vst [vmem:[%s1422_s5] sm:$0xff] %v794_v53  ;;  %v795_v55 = vmax.f32 %v790_v54, 0.0 }
 0x203   :  { %v763_v56 = vpop.f32.mrb[28].mxu1 }
 0x204   :  { %800 = vst [vmem:[%s1422_s5 + $0x8] sm:$0xff] %v795_v55  ;;  %v779_v57 = vadd.f32 %v763_v56, %v635_v31  ;;  %v1101_v58 = vpop.f32.mrb[29].mxu1 }
 0x205   :  { %v766_v59 = vpop.f32.mrb[30].mxu1 }
 0x206   :  { %v791_v60 = vadd.f32 %v905_v46, %v779_v57  ;;  %v780_v61 = vadd.f32 %v766_v59, %v638_v34  ;;  %v1102_v62 = vpop.f32.mrb[31].mxu1 }
 0x208   :  { %v796_v63 = vmax.f32 %v791_v60, 0.0  ;;  %v792_v1 = vadd.f32 %v905_v46, %v780_v61 }
 0x20a   :  { %906 = vst [vmem:[%s1422_s5 + $0xe] sm:$0xfc] %v796_v63  ;;  %v797_v2 = vmax.f32 %v792_v1, 0.0 }
 0x20b   :  { %v771_v3 = vpop.f32.mrb[32].mxu1 }
 0x20c   :  { %907 = vst [vmem:[%s1422_s5 + $0x16] sm:$0xff] %v797_v2  ;;  %v781_v4 = vadd.f32 %v771_v3, %v643_v40  ;;  %v1105_v5 = vpop.f32.mrb[33].mxu1 }
 0x20d   :  { %v774_v6 = vpop.f32.mrb[34].mxu1 }
 0x20e   :  { %v793_v7 = vadd.f32 %v905_v46, %v781_v4  ;;  %v1106_v8 = vpop.f32.mrb[35].mxu1 }
 0x210   :  { %v798_v9 = vmax.f32 %v793_v7, 0.0 }
 0x212   :  { %908 = vst [vmem:[%s1422_s5 + $0x1e] sm:$0x3] %v798_v9 }

</bundles_post_ra>
